<compile_context>
chip_gen: v7x
topology: tpu7x:2x2x1
jax: 0.10.0
libtpu: 0.0.40
codegen_flags: <defaults>
</compile_context>

<pallas_src>
import functools
import math

import jax
import jax.numpy as jnp
from jax.experimental import pallas as pl
from jax.experimental.pallas import tpu as pltpu


def _rup(x, m):
    return ((x + m - 1) // m) * m


# ------------------------------ Pallas kernel --------------------------------
def _linear_relu_kernel(x_ref, w_ref, b_ref, *o_refs, head_layout, use_mxu):
    """Fused y = relu(x @ W + b); columns are split into the output refs.

    x_ref : (M, K) f32 VMEM
    w_ref : (K, N) f32 VMEM   (N = this block's width)
    b_ref : (1, N) f32 VMEM
    o_refs: one (M, width_i) f32 VMEM ref per (offset_i, width_i) entry of
            head_layout (offsets are static, 128-aligned in the fused case).
    """
    x = x_ref[...]
    w = w_ref[...]
    b = b_ref[...]
    m, k_dim = x.shape
    n = w.shape[1]

    if use_mxu:
        # Larger-batch regime: let the MXU do the contraction.
        acc = jnp.dot(x, w, preferred_element_type=jnp.float32) + b
    else:
        # Tiny M / tiny K regime: K broadcast FMAs over the whole (M, N) tile
        # on the VPU.  One accumulator covers all rows (a (M, N) tile with
        # M <= 8 occupies the same vregs as a single row), so this is half the
        # VALU work of a per-row loop and needs no concatenation.
        acc = jnp.broadcast_to(b, (m, n))
        for k in range(k_dim):                      # unrolled, K is tiny
            acc = acc + x[:, k:k + 1] * w[k:k + 1, :]

    acc = jnp.maximum(acc, 0.0)
    for o_ref, (off, width) in zip(o_refs, head_layout):
        o_ref[...] = acc[:, off:off + width]


def _linear_relu_heads(x, w, b, head_layout, *, vmem_budget_bytes=16 << 20):
    """relu(x @ w + b) -> tuple of (M, width) f32 arrays (one per head).

    x : (M, K) f32      w : (K, N) f32      b : (1, N) f32
    head_layout : tuple of (column_offset, width) pairs into w's columns.
    """
    x = x.astype(jnp.float32)
    M, K = x.shape
    Kw, N = w.shape
    assert Kw == K and b.shape == (1, N)

    use_mxu = M >= 8
    out_elems = sum(M * width for _, width in head_layout)
    # Single-block footprint (no grid => no double buffering).
    footprint = 4 * (M * K + K * N + N + M * N + out_elems)

    if footprint <= vmem_budget_bytes:
        # ---- Single-step path: one kernel invocation, everything in VMEM,
        # per-head outputs written at their exact widths (no post-call slices).
        vmem = pl.BlockSpec(memory_space=pltpu.MemorySpace.VMEM)
        out_shapes = tuple(jax.ShapeDtypeStruct((M, width), jnp.float32)
                           for _, width in head_layout)
        outs = pl.pallas_call(
            functools.partial(_linear_relu_kernel,
                              head_layout=tuple(head_layout),
                              use_mxu=use_mxu),
            out_shape=out_shapes,
            in_specs=[vmem, vmem, vmem],
            out_specs=tuple(vmem for _ in head_layout),
        )(x, w, b)
        return outs

    # ---- Fallback for a hypothetical scaled-up fused head set that would not
    # fit in one VMEM block: tile the N axis (lane-padded, single output),
    # slice per head afterwards.  Never taken at current sizes.
    Np = _rup(N, 128)
    if Np != N:
        w = jnp.zeros((K, Np), jnp.float32).at[:, :N].set(w)
        b = jnp.zeros((1, Np), jnp.float32).at[:, :N].set(b)
    tn = next(t for t in (512, 256, 128) if Np % t == 0)
    y = pl.pallas_call(
        functools.partial(_linear_relu_kernel,
                          head_layout=((0, tn),), use_mxu=use_mxu),
        out_shape=jax.ShapeDtypeStruct((M, Np), jnp.float32),
        grid=(Np // tn,),
        in_specs=[
            pl.BlockSpec((M, K), lambda j: (0, 0)),
            pl.BlockSpec((K, tn), lambda j: (0, j)),
            pl.BlockSpec((1, tn), lambda j: (0, j)),
        ],
        out_specs=pl.BlockSpec((M, tn), lambda j: (0, j)),
        compiler_params=pltpu.CompilerParams(
            dimension_semantics=("parallel",)),
    )(x, w, b)
    return tuple(y[:, off:off + width] for off, width in head_layout)


# ------------------------------ module wrappers -------------------------------
class ClassConditioning:
    """Pallas port of the PyTorch ClassConditioning module:
       forward(x) = ReLU(Linear(x)).view(-1, C, H, W)."""

    def __init__(self, height, width, inp, num_channels=None, *, key):
        self.height = height
        self.width = width
        self.inp = inp
        self.num_channels = num_channels if num_channels is not None else inp
        self.n_out = height * width * self.num_channels

        kw, kb = jax.random.split(key)
        bound = 1.0 / math.sqrt(inp)                 # nn.Linear default init
        # Parameters stay f32 (no bf16 quantization; the kernel is
        # launch-overhead bound, so narrower weights buy nothing here).
        self.w = jax.random.uniform(kw, (inp, self.n_out), jnp.float32,
                                    -bound, bound)
        self.b = jax.random.uniform(kb, (1, self.n_out), jnp.float32,
                                    -bound, bound)

    def __call__(self, x):
        (y,) = _linear_relu_heads(x, self.w, self.b, ((0, self.n_out),))
        return y.reshape(-1, self.num_channels, self.height, self.width)

    def reference(self, x):
        y = jnp.maximum(x @ self.w + self.b, 0.0)
        return y.reshape(-1, self.num_channels, self.height, self.width)


class FusedClassConditioning:
    """Several ClassConditioning heads sharing the same input, computed by ONE
    pallas_call.  Per-head weight columns are padded to a 128 boundary inside
    the concatenated weight (so in-kernel column offsets stay lane-aligned),
    but each head's output is emitted at its EXACT width by the kernel, so the
    only post-call ops are the module-mandated reshapes."""

    def __init__(self, heads):
        assert len({h.inp for h in heads}) == 1
        self.heads = heads
        k = heads[0].inp
        wcols, bcols, layout, off = [], [], [], 0
        for h in heads:
            npad = _rup(h.n_out, 128)
            wcols.append(jnp.zeros((k, npad), jnp.float32)
                         .at[:, :h.n_out].set(h.w))
            bcols.append(jnp.zeros((1, npad), jnp.float32)
                         .at[:, :h.n_out].set(h.b))
            layout.append((off, h.n_out))
            off += npad
        # Built once at init — never per call.
        self.w = jnp.concatenate(wcols, axis=1)      # (K, sum Np_i)
        self.b = jnp.concatenate(bcols, axis=1)
        self.layout = tuple(layout)

    def __call__(self, x):
        ys = _linear_relu_heads(x, self.w, self.b, self.layout)
        return [y.reshape(-1, h.num_channels, h.height, h.width)
                for y, h in zip(ys, self.heads)]


# ----------------------------------- main -------------------------------------
if __name__ == "__main__":
    key = jax.random.PRNGKey(0)
    k_x, k_h1, k_h2, k_h3 = jax.random.split(key, 4)

    batch, num_classes = 2, 4
    labels = jax.random.randint(k_x, (batch,), 0, num_classes)
    x = jax.nn.one_hot(labels, num_classes, dtype=jnp.float32)    # (2, 4)

    # Single module, matching the PyTorch spec (num_channels defaults to inp).
    cc = ClassConditioning(height=16, width=16, inp=num_classes, key=k_h1)
    out = jax.block_until_ready(cc(x))
    assert out.shape == (batch, num_classes, 16, 16), out.shape
    assert bool(jnp.all(jnp.isfinite(out)))
    ref = cc.reference(x)
    assert bool(jnp.allclose(out, ref, rtol=1e-5, atol=1e-5)), \
        float(jnp.max(jnp.abs(out - ref)))

    # Fused variant: several conditioning heads computed by one Pallas call.
    heads = [
        cc,
        ClassConditioning(height=8, width=8, inp=num_classes, key=k_h2),
        ClassConditioning(height=1, width=16, inp=num_classes,
                          num_channels=4, key=k_h3),
    ]
    fused = FusedClassConditioning(heads)
    fused_outs = jax.block_until_ready(fused(x))
    for h, o in zip(heads, fused_outs):
        assert o.shape == (batch, h.num_channels, h.height, h.width), o.shape
        assert bool(jnp.all(jnp.isfinite(o)))
        assert bool(jnp.allclose(o, h.reference(x), rtol=1e-5, atol=1e-5))

    print("KERNEL_OK")
</pallas_src>

<mosaic_0001>
module attributes {stable_mosaic.version = 11 : i64} {
  func.func @_linear_relu_kernel(%arg0: memref<2x4xf32, #tpu.memory_space<vmem>>, %arg1: memref<4x1024xf32, #tpu.memory_space<vmem>>, %arg2: memref<1x1024xf32, #tpu.memory_space<vmem>>, %arg3: memref<2x1024xf32, #tpu.memory_space<vmem>>) attributes {dimension_semantics = [], scalar_prefetch = 0 : i64, scratch_operands = 0 : i64, tpu.core_type = #tpu.core_type<tc>} {
    %c0 = arith.constant 0 : index
    %c0_0 = arith.constant 0 : index
    %0 = vector.load %arg0[%c0, %c0_0] : memref<2x4xf32, #tpu.memory_space<vmem>>, vector<2x4xf32>
    %c0_1 = arith.constant 0 : index
    %c0_2 = arith.constant 0 : index
    %1 = vector.load %arg1[%c0_1, %c0_2] : memref<4x1024xf32, #tpu.memory_space<vmem>>, vector<4x1024xf32>
    %c0_3 = arith.constant 0 : index
    %c0_4 = arith.constant 0 : index
    %2 = vector.load %arg2[%c0_3, %c0_4] : memref<1x1024xf32, #tpu.memory_space<vmem>>, vector<1x1024xf32>
    %3 = vector.shape_cast %2 : vector<1x1024xf32> to vector<1x1024xf32>
    %4 = vector.broadcast %3 : vector<1x1024xf32> to vector<2x1024xf32>
    %5 = vector.extract_strided_slice %0 {offsets = [0, 0], sizes = [2, 1], strides = [1, 1]} : vector<2x4xf32> to vector<2x1xf32>
    %6 = vector.extract_strided_slice %1 {offsets = [0, 0], sizes = [1, 1024], strides = [1, 1]} : vector<4x1024xf32> to vector<1x1024xf32>
    %7 = vector.broadcast %5 : vector<2x1xf32> to vector<2x1024xf32>
    %8 = vector.broadcast %6 : vector<1x1024xf32> to vector<2x1024xf32>
    %9 = arith.mulf %7, %8 : vector<2x1024xf32>
    %10 = arith.addf %4, %9 : vector<2x1024xf32>
    %11 = vector.extract_strided_slice %0 {offsets = [0, 1], sizes = [2, 1], strides = [1, 1]} : vector<2x4xf32> to vector<2x1xf32>
    %12 = vector.extract_strided_slice %1 {offsets = [1, 0], sizes = [1, 1024], strides = [1, 1]} : vector<4x1024xf32> to vector<1x1024xf32>
    %13 = vector.broadcast %11 : vector<2x1xf32> to vector<2x1024xf32>
    %14 = vector.broadcast %12 : vector<1x1024xf32> to vector<2x1024xf32>
    %15 = arith.mulf %13, %14 : vector<2x1024xf32>
    %16 = arith.addf %10, %15 : vector<2x1024xf32>
    %17 = vector.extract_strided_slice %0 {offsets = [0, 2], sizes = [2, 1], strides = [1, 1]} : vector<2x4xf32> to vector<2x1xf32>
    %18 = vector.extract_strided_slice %1 {offsets = [2, 0], sizes = [1, 1024], strides = [1, 1]} : vector<4x1024xf32> to vector<1x1024xf32>
    %19 = vector.broadcast %17 : vector<2x1xf32> to vector<2x1024xf32>
    %20 = vector.broadcast %18 : vector<1x1024xf32> to vector<2x1024xf32>
    %21 = arith.mulf %19, %20 : vector<2x1024xf32>
    %22 = arith.addf %16, %21 : vector<2x1024xf32>
    %23 = vector.extract_strided_slice %0 {offsets = [0, 3], sizes = [2, 1], strides = [1, 1]} : vector<2x4xf32> to vector<2x1xf32>
    %24 = vector.extract_strided_slice %1 {offsets = [3, 0], sizes = [1, 1024], strides = [1, 1]} : vector<4x1024xf32> to vector<1x1024xf32>
    %25 = vector.broadcast %23 : vector<2x1xf32> to vector<2x1024xf32>
    %26 = vector.broadcast %24 : vector<1x1024xf32> to vector<2x1024xf32>
    %27 = arith.mulf %25, %26 : vector<2x1024xf32>
    %28 = arith.addf %22, %27 : vector<2x1024xf32>
    %cst = arith.constant 0.000000e+00 : f32
    %29 = vector.broadcast %cst : f32 to vector<2x1024xf32>
    %30 = arith.maximumf %28, %29 : vector<2x1024xf32>
    %c0_5 = arith.constant 0 : index
    %c0_6 = arith.constant 0 : index
    %31 = vector.load %arg3[%c0_5, %c0_6] : memref<2x1024xf32, #tpu.memory_space<vmem>>, vector<2x1024xf32>
    tpu.vector_store %arg3[%c0_5, %c0_6], %30 {strides = array<i32>} : memref<2x1024xf32, #tpu.memory_space<vmem>>, vector<2x1024xf32>,
    return
  }
}

</mosaic_0001>

<bundles_post_ra>
// kernel: tpu_custom_call.1
= control target key start
LH: loop header
LB: loop body
LE: loop exit
PB: predicated region body
PF: predicated region fallthrough
CT: control target
= control target key end

     0   :  { %8 = vsyncpa [#allocation3], 0  ;;  %s928_s0 = inlined_call_operand.hbm [shape: f32[2,4], index: 0, kind: input, shape index: {}]   ;;  %s929_s1 = inlined_call_operand.hbm [shape: f32[4,1024], index: 1, kind: input, shape index: {}]   ;;  %s930_s2 = inlined_call_operand.hbm [shape: f32[1,1024], index: 2, kind: input, shape index: {}]   ;;  %s931_s3 = inlined_call_operand.hbm [shape: f32[2,1024], index: 3, kind: output, shape index: {}]  }
   0x1   :  { %9 = vsyncpa [#allocation6], 0 }
   0x2   :  { %10 = vsyncpa [#allocation4], 0  ;;  %s648_s12 = smov [#allocation5]   ;;  %s649_s14 = smov [#allocation2]  }
   0x3   :  { %s27_s13 = sshll.u32 %s648_s12, 4  ;;  %s17_s15 = sshll.u32 %s649_s14, 4  ;;  %s28_s13 = int_to_ptr.vmem [resolvable:$true] %s27_s13  ;;  %s18_s15 = int_to_ptr.vmem [resolvable:$true] %s17_s15 }
   0x4   :  { %s554_s18 = scalar_lea.hbm %s929_s1, 512 }
   0x5   :  { %p555_p0 = scmp.ne.s32.totalorder %s929_s1, %s554_s18  ;;  %p558_p1 = scmp.lt.u32.totalorder %s554_s18, %s929_s1 }
   0x7   :  { %p560_p2 = pnand %p558_p1, %p555_p0 }
   0x9   :  { %563 = shalt.err (!%p560_p2)
}
   0xa   :  { %s564_s23 = scalar_lea.vmem %s28_s13, 512  ;;  %p569_p4 = scmp.lt.s32.totalorder %s28_s13, %s28_s13 }
   0xb   :  { %p565_p3 = scmp.ne.s32.totalorder %s28_s13, %s564_s23  ;;  %p570_p5 = scmp.lt.s32.totalorder %s564_s23, %s564_s23 }
   0xd   :  { %p571_p6 = por %p570_p5, %p569_p4 }
   0xf   :  { %p572_p7 = pnand %p571_p6, %p565_p3 }
  0x11   :  { %575 = shalt.err (!%p572_p7)
}
  0x12   :  { %30 = dma.hbm_to_vmem [thread:$0]  %s929_s1, 512, %s28_s13, [#allocation6]  }
  0x13   :  { %s576_s28 = scalar_lea.hbm %s928_s0, 32 }
  0x14   :  { %p577_p8 = scmp.ne.s32.totalorder %s928_s0, %s576_s28  ;;  %p580_p9 = scmp.lt.u32.totalorder %s576_s28, %s928_s0 }
  0x16   :  { %p582_p10 = pnand %p580_p9, %p577_p8 }
  0x18   :  { %585 = shalt.err (!%p582_p10)
}
  0x19   :  { %s586_s6 = scalar_lea.vmem %s18_s15, 32  ;;  %p591_p12 = scmp.lt.s32.totalorder %s18_s15, %s18_s15 }
  0x1a   :  { %p587_p11 = scmp.ne.s32.totalorder %s18_s15, %s586_s6  ;;  %p592_p13 = scmp.lt.s32.totalorder %s586_s6, %s586_s6 }
  0x1c   :  { %p593_p0 = por %p592_p13, %p591_p12 }
  0x1e   :  { %p594_p1 = pnand %p593_p0, %p587_p11 }
  0x20   :  { %597 = shalt.err (!%p594_p1)
}
  0x21   :  { %20 = dma.hbm_to_vmem [thread:$0]  %s928_s0, 32, %s18_s15, [#allocation3]  }
  0x22   :  { %s650_s8 = smov [#allocation7]   ;;  %s598_s12 = scalar_lea.hbm %s930_s2, 128 }
  0x23   :  { %s37_s9 = sshll.u32 %s650_s8, 4  ;;  %p599_p2 = scmp.ne.s32.totalorder %s930_s2, %s598_s12  ;;  %s38_s9 = int_to_ptr.vmem [resolvable:$true] %s37_s9 }
  0x24   :  { %p602_p3 = scmp.lt.u32.totalorder %s598_s12, %s930_s2 }
  0x26   :  { %p604_p4 = pnand %p602_p3, %p599_p2 }
  0x28   :  { %607 = shalt.err (!%p604_p4)
}
  0x29   :  { %s608_s18 = scalar_lea.vmem %s38_s9, 128  ;;  %p613_p6 = scmp.lt.s32.totalorder %s38_s9, %s38_s9 }
  0x2a   :  { %p609_p5 = scmp.ne.s32.totalorder %s38_s9, %s608_s18  ;;  %p614_p7 = scmp.lt.s32.totalorder %s608_s18, %s608_s18 }
  0x2c   :  { %p615_p8 = por %p614_p7, %p613_p6 }
  0x2e   :  { %p616_p9 = pnand %p615_p8, %p609_p5 }
  0x30   :  { %619 = shalt.err (!%p616_p9)
}
  0x31   :  { %40 = dma.hbm_to_vmem [thread:$0]  %s930_s2, 128, %s38_s9, [#allocation6]  }
  0x32   :  { %642 = dma.done.wait [#allocation3], 32  }
  0x33   :  { %643 = vsyncadd [#allocation3], 4294967264 }
  0x34   :  { %644 = dma.done.wait [#allocation6], 640  }
  0x35   :  { %645 = vsyncadd [#allocation6], 4294966656  ;;  %v651_v0 = vmov 0   ;;  %v652_v1 = vmov 2   ;;  %v50_v2 = vld [vmem:[#allocation2] sm:$0x3]  ;;  %v57_v5 = vlaneseq }
  0x36   :  { %549 = vset.pattern.permute.xlu0 %v651_v0  ;;  %551 = vset.pattern.permute.xlu1 %v652_v1  ;;  %v653_v3 = vmov 1   ;;  %v654_v4 = vmov 3   ;;  %v721_v9 = vld [vmem:[#allocation5] sm:$0xff]  ;;  %v723_v10 = vld [vmem:[#allocation5 + $0x8] sm:$0xff]  ;;  %v725_v11 = vld [vmem:[#allocation5 + $0x10] sm:$0xff]  ;;  %s656_s2 = smov [#allocation8]  }
  0x37   :  { %99 = vperm.xlu0 %549, %v50_v2   ;;  %287 = vperm.xlu1 %551, %v50_v2   ;;  %v713_v6 = vshrl.u32 %v57_v5, 7  ;;  %v727_v12 = vld [vmem:[#allocation5 + $0x18] sm:$0xff]  ;;  %v797_v41 = vld [vmem:[#allocation7] sm:$0xff]  ;;  %v655_v62 = vmov 1983009808   ;;  %s530_s19 = sshll.u32 %s656_s2, 4  ;;  %s531_s19 = int_to_ptr.vmem [resolvable:$true] %s530_s19 }
  0x38   :  { %v489_v63 = vunpack.c.l.s4 %v655_v62  ;;  %s620_s20 = scalar_lea.vmem %s531_s19, 256  ;;  %p625_p11 = scmp.lt.s32.totalorder %s531_s19, %s531_s19 }
  0x39   :  { %v716_v7 = vsub.s32 0, %v713_v6  ;;  %v719_v8 = vsub.s32 4, %v713_v6  ;;  %v734_v15 = vsub.s32 1, %v713_v6  ;;  %v737_v16 = vsub.s32 5, %v713_v6  ;;  %p621_p10 = scmp.ne.s32.totalorder %s531_s19, %s620_s20  ;;  %p626_p12 = scmp.lt.s32.totalorder %s620_s20, %s620_s20 }
  0x3a   :  { %v750_v22 = vsub.s32 2, %v713_v6  ;;  %v800_v42 = vsub.s32 3, %v713_v6  ;;  %v803_v43 = vsub.s32 6, %v713_v6  ;;  %v824_v50 = vsub.s32 7, %v713_v6 }
  0x3b   :  { %550 = vset.pattern.permute.xlu0 %v653_v3  ;;  %552 = vset.pattern.permute.xlu1 %v654_v4  ;;  %v109_v13 = vrot.slane %v721_v9, %v716_v7  ;;  %v113_v14 = vrot.slane %v721_v9, %v719_v8  ;;  %v117_v17 = vrot.slane %v723_v10, %v716_v7  ;;  %p627_p13 = por %p626_p12, %p625_p11 }
  0x3c   :  { %195 = vperm.xlu0 %550, %v50_v2   ;;  %379 = vperm.xlu1 %552, %v50_v2   ;;  %v121_v18 = vrot.slane %v723_v10, %v719_v8  ;;  %v125_v19 = vrot.slane %v725_v11, %v716_v7  ;;  %v129_v20 = vrot.slane %v725_v11, %v719_v8 }
  0x3d   :  { %v133_v21 = vrot.slane %v727_v12, %v716_v7  ;;  %v137_v23 = vrot.slane %v727_v12, %v719_v8  ;;  %v755_v24 = vrot.slane %v109_v13, %v716_v7  ;;  %v758_v25 = vrot.slane %v113_v14, %v716_v7  ;;  %p628_p0 = pnand %p627_p13, %p621_p10 }
  0x3e   :  { %v201_v26 = vrot.slane %v721_v9, %v734_v15  ;;  %v205_v27 = vrot.slane %v721_v9, %v737_v16  ;;  %v209_v28 = vrot.slane %v723_v10, %v734_v15  ;;  %v213_v29 = vrot.slane %v723_v10, %v737_v16 }
  0x3f   :  { %v217_v30 = vrot.slane %v725_v11, %v734_v15  ;;  %v771_v31 = vrot.slane %v117_v17, %v716_v7  ;;  %v774_v32 = vrot.slane %v121_v18, %v716_v7  ;;  %v221_v33 = vrot.slane %v725_v11, %v737_v16 }
  0x40   :  { %553 = vset.pattern.permute.xlu0 %v654_v4  ;;  %v225_v34 = vrot.slane %v727_v12, %v734_v15  ;;  %v781_v35 = vrot.slane %v125_v19, %v716_v7  ;;  %v784_v36 = vrot.slane %v129_v20, %v716_v7  ;;  %v787_v37 = vrot.slane %v133_v21, %v716_v7 }
  0x41   :  { %v229_v38 = vrot.slane %v727_v12, %v737_v16  ;;  %v792_v39 = vrot.slane %v137_v23, %v716_v7  ;;  %v795_v40 = vrot.slane %v201_v26, %v734_v15  ;;  %v806_v44 = vrot.slane %v205_v27, %v734_v15 }
  0x42   :  { %v809_v45 = vrot.slane %v209_v28, %v734_v15  ;;  %v812_v46 = vrot.slane %v213_v29, %v734_v15  ;;  %v815_v47 = vrot.slane %v217_v30, %v734_v15  ;;  %v818_v48 = vrot.slane %v221_v33, %v734_v15 }
  0x43   :  { %v821_v49 = vrot.slane %v225_v34, %v734_v15  ;;  %v827_v51 = vrot.slane %v229_v38, %v734_v15  ;;  %v60_v52 = vrot.slane %v797_v41, %v716_v7  ;;  %v64_v53 = vrot.slane %v797_v41, %v734_v15 }
  0x44   :  { %v293_v54 = vrot.slane %v721_v9, %v750_v22  ;;  %v68_v55 = vrot.slane %v797_v41, %v750_v22  ;;  %v72_v56 = vrot.slane %v797_v41, %v800_v42  ;;  %v76_v57 = vrot.slane %v797_v41, %v719_v8 }
  0x45   :  { %v80_v58 = vrot.slane %v797_v41, %v737_v16  ;;  %v84_v59 = vrot.slane %v797_v41, %v803_v43  ;;  %v297_v60 = vrot.slane %v721_v9, %v803_v43  ;;  %v301_v61 = vrot.slane %v723_v10, %v750_v22 }
  0x46   :  { %v88_v0 = vrot.slane %v797_v41, %v824_v50  ;;  %v305_v1 = vrot.slane %v723_v10, %v803_v43  ;;  %v309_v2 = vrot.slane %v725_v11, %v750_v22  ;;  %v313_v3 = vrot.slane %v725_v11, %v803_v43 }
  0x47   :  { %v317_v4 = vrot.slane %v727_v12, %v750_v22  ;;  %v321_v5 = vrot.slane %v727_v12, %v803_v43  ;;  %v333_v7 = vrot.slane %v293_v54, %v750_v22  ;;  %v385_v8 = vrot.slane %v721_v9, %v800_v42 }
  0x48   :  { %v389_v13 = vrot.slane %v721_v9, %v824_v50  ;;  %v393_v14 = vrot.slane %v723_v10, %v800_v42  ;;  %v397_v15 = vrot.slane %v723_v10, %v824_v50  ;;  %v401_v16 = vrot.slane %v725_v11, %v800_v42 }
  0x49   :  { %v405_v17 = vrot.slane %v725_v11, %v824_v50  ;;  %v409_v18 = vrot.slane %v727_v12, %v800_v42  ;;  %v413_v19 = vrot.slane %v727_v12, %v824_v50  ;;  %v490_v20 = vunpack.c.0.s8 %v489_v63 }
  0x4a   :  { %v337_v9 = vrot.slane %v297_v60, %v750_v22  ;;  %v341_v21 = vrot.slane %v301_v61, %v750_v22  ;;  %v345_v23 = vrot.slane %v305_v1, %v750_v22  ;;  %v349_v10 = vrot.slane %v309_v2, %v750_v22 }
  0x4b   :  { %v353_v26 = vrot.slane %v313_v3, %v750_v22  ;;  %v357_v27 = vrot.slane %v317_v4, %v750_v22  ;;  %v361_v11 = vrot.slane %v321_v5, %v750_v22  ;;  %v425_v28 = vrot.slane %v385_v8, %v800_v42 }
  0x4c   :  { %v429_v29 = vrot.slane %v389_v13, %v800_v42  ;;  %v433_v12 = vrot.slane %v393_v14, %v800_v42  ;;  %v437_v30 = vrot.slane %v397_v15, %v800_v42  ;;  %v441_v33 = vrot.slane %v401_v16, %v800_v42 }
  0x4d   :  { %v445_v38 = vrot.slane %v405_v17, %v800_v42  ;;  %v449_v41 = vrot.slane %v409_v18, %v800_v42  ;;  %v453_v43 = vrot.slane %v413_v19, %v800_v42  ;;  %v894_v50 = vsub.s32 %v490_v20, %v713_v6 }
  0xb6   :  { %v100_v34 = vpop.permute.xlu0 %99  ;;  %v288_v42 = vpop.permute.xlu1 %287 }
  0xb7   :  { %v178_v22 = vmul.f32 %v755_v24, %v100_v34  ;;  %v179_v54 = vmul.f32 %v758_v25, %v100_v34  ;;  %v180_v60 = vmul.f32 %v771_v31, %v100_v34  ;;  %v181_v61 = vmul.f32 %v774_v32, %v100_v34 }
  0xb8   :  { %v182_v62 = vmul.f32 %v781_v35, %v100_v34  ;;  %v183_v63 = vmul.f32 %v784_v36, %v100_v34  ;;  %v184_v1 = vmul.f32 %v787_v37, %v100_v34  ;;  %v185_v2 = vmul.f32 %v792_v39, %v100_v34 }
  0xb9   :  { %v186_v3 = vadd.f32 %v178_v22, %v60_v52  ;;  %v187_v6 = vadd.f32 %v179_v54, %v64_v53  ;;  %v188_v4 = vadd.f32 %v180_v60, %v68_v55  ;;  %v189_v5 = vadd.f32 %v181_v61, %v72_v56 }
  0xba   :  { %v190_v24 = vadd.f32 %v182_v62, %v76_v57  ;;  %v191_v8 = vadd.f32 %v183_v63, %v80_v58  ;;  %v192_v25 = vadd.f32 %v184_v1, %v84_v59  ;;  %v193_v13 = vadd.f32 %v185_v2, %v88_v0 }
  0xbb   :  { %v196_v31 = vpop.permute.xlu0 %195  ;;  %v362_v14 = vmul.f32 %v333_v7, %v288_v42  ;;  %v363_v32 = vmul.f32 %v337_v9, %v288_v42  ;;  %v364_v15 = vmul.f32 %v341_v21, %v288_v42  ;;  %v365_v35 = vmul.f32 %v345_v23, %v288_v42  ;;  %v380_v18 = vpop.permute.xlu1 %379 }
  0xbc   :  { %v270_v36 = vmul.f32 %v795_v40, %v196_v31  ;;  %v271_v37 = vmul.f32 %v806_v44, %v196_v31  ;;  %v272_v39 = vmul.f32 %v809_v45, %v196_v31  ;;  %v273_v52 = vmul.f32 %v812_v46, %v196_v31 }
  0xbd   :  { %v274_v53 = vmul.f32 %v815_v47, %v196_v31  ;;  %v275_v55 = vmul.f32 %v818_v48, %v196_v31  ;;  %v276_v56 = vmul.f32 %v821_v49, %v196_v31  ;;  %v277_v57 = vmul.f32 %v827_v51, %v196_v31 }
  0xbe   :  { %v278_v58 = vadd.f32 %v270_v36, %v186_v3  ;;  %v279_v59 = vadd.f32 %v271_v37, %v187_v6  ;;  %v280_v0 = vadd.f32 %v272_v39, %v188_v4  ;;  %v281_v7 = vadd.f32 %v273_v52, %v189_v5 }
  0xbf   :  { %v282_v16 = vadd.f32 %v274_v53, %v190_v24  ;;  %v283_v40 = vadd.f32 %v275_v55, %v191_v8  ;;  %v284_v17 = vadd.f32 %v276_v56, %v192_v25  ;;  %v285_v44 = vadd.f32 %v277_v57, %v193_v13 }
  0xc0   :  { %v366_v45 = vmul.f32 %v349_v10, %v288_v42  ;;  %v367_v19 = vmul.f32 %v353_v26, %v288_v42  ;;  %v368_v46 = vmul.f32 %v357_v27, %v288_v42  ;;  %v369_v20 = vmul.f32 %v361_v11, %v288_v42 }
  0xc1   :  { %v370_v47 = vadd.f32 %v362_v14, %v278_v58  ;;  %v371_v9 = vadd.f32 %v363_v32, %v279_v59  ;;  %v372_v48 = vadd.f32 %v364_v15, %v280_v0  ;;  %v373_v21 = vadd.f32 %v365_v35, %v281_v7 }
  0xc2   :  { %v374_v49 = vadd.f32 %v366_v45, %v282_v16  ;;  %v375_v23 = vadd.f32 %v367_v19, %v283_v40  ;;  %v376_v51 = vadd.f32 %v368_v46, %v284_v17  ;;  %v377_v34 = vadd.f32 %v369_v20, %v285_v44 }
  0xc3   :  { %v454_v22 = vmul.f32 %v425_v28, %v380_v18  ;;  %v455_v54 = vmul.f32 %v429_v29, %v380_v18  ;;  %v456_v60 = vmul.f32 %v433_v12, %v380_v18  ;;  %v457_v61 = vmul.f32 %v437_v30, %v380_v18 }
  0xc4   :  { %v458_v62 = vmul.f32 %v441_v33, %v380_v18  ;;  %v459_v63 = vmul.f32 %v445_v38, %v380_v18  ;;  %v460_v1 = vmul.f32 %v449_v41, %v380_v18  ;;  %v461_v2 = vmul.f32 %v453_v43, %v380_v18 }
  0xc5   :  { %v462_v10 = vadd.f32 %v454_v22, %v370_v47  ;;  %v463_v26 = vadd.f32 %v455_v54, %v371_v9  ;;  %v464_v27 = vadd.f32 %v456_v60, %v372_v48  ;;  %v465_v11 = vadd.f32 %v457_v61, %v373_v21 }
  0xc6   :  { %v466_v42 = vadd.f32 %v458_v62, %v374_v49  ;;  %v467_v3 = vadd.f32 %v459_v63, %v375_v23  ;;  %v468_v6 = vadd.f32 %v460_v1, %v376_v51  ;;  %v469_v4 = vadd.f32 %v461_v2, %v377_v34 }
  0xc7   :  { %v470_v5 = vmax.f32 %v462_v10, 0.0  ;;  %v471_v24 = vmax.f32 %v463_v26, 0.0  ;;  %v472_v8 = vmax.f32 %v464_v27, 0.0  ;;  %v473_v25 = vmax.f32 %v465_v11, 0.0 }
  0xc8   :  { %v474_v28 = vmax.f32 %v466_v42, 0.0  ;;  %v475_v29 = vmax.f32 %v467_v3, 0.0  ;;  %v476_v12 = vmax.f32 %v468_v6, 0.0  ;;  %v477_v30 = vmax.f32 %v469_v4, 0.0 }
  0xc9   :  { %v486_v33 = vcombine.low %v470_v5, %v471_v24  ;;  %v487_v38 = vcombine.low %v472_v8, %v473_v25 }
  0xca   :  { %v503_v41 = vcombine.low %v474_v28, %v475_v29  ;;  %v504_v43 = vcombine.low %v476_v12, %v477_v30 }
  0xcb   :  { %v494_v13 = vrot.slane %v486_v33, %v894_v50  ;;  %v501_v31 = vrot.slane %v487_v38, %v894_v50 }
  0xcc   :  { %v511_v14 = vrot.slane %v503_v41, %v894_v50  ;;  %v518_v32 = vrot.slane %v504_v43, %v894_v50 }
  0xcd   :  { %v502_v15 = vcombine.low %v494_v13, %v501_v31 }
  0xce   :  { %v519_v35 = vcombine.low %v511_v14, %v518_v32 }
  0xcf   :  { %522 = vst [vmem:[#allocation8] sm:$0xff] %v502_v15 }
  0xd0   :  { %523 = vst [vmem:[#allocation8 + $0x8] sm:$0xff] %v519_v35 }
  0xd1   :  { %631 = shalt.err (!%p628_p0)
}
  0xd2   :  { %s632_s23 = scalar_lea.hbm %s931_s3, 256 }
  0xd3   :  { %p633_p1 = scmp.ne.s32.totalorder %s931_s3, %s632_s23  ;;  %p636_p2 = scmp.lt.u32.totalorder %s632_s23, %s931_s3 }
  0xd5   :  { %p638_p3 = pnand %p636_p2, %p633_p1 }
  0xd7   :  { %641 = shalt.err (!%p638_p3)
}
  0xd8   :  { %533 = dma.vmem_to_hbm [thread:$0]  %s531_s19, 256, %s931_s3, [#allocation4]  }
  0xd9   :  { %646 = dma.done.wait [#allocation4], 256  }
  0xda   :  { %647 = vsyncadd [#allocation4], 4294967040 }
  0xdb   :  { %537 = vsyncpa [#allocation3], 1 }
  0xdc   :  { %538 = vsyncpa [#allocation6], 1 }
  0xdd   :  { %539 = vsyncpa [#allocation4], 1 }

</bundles_post_ra>
